<compile_context>
chip_gen: v7x
topology: tpu7x:2x2x1
jax: 0.10.0
libtpu: 0.0.40
codegen_flags: <defaults>
</compile_context>

<pallas_src>
import jax
import jax.numpy as jnp
from jax.experimental import pallas as pl
from jax.experimental.pallas import tpu as pltpu


def _round_up(x, m):
    return ((x + m - 1) // m) * m


def _vmem_limit_bytes():
    """Generation-aware scoped-VMEM limit: ~3/4 of physical VMEM, capped at 100 MiB."""
    cap = 64 * 1024 * 1024  # conservative default (v7x physical VMEM per TC)
    try:
        info = pltpu.get_tpu_info()
        cap = int(getattr(info, "vmem_capacity_bytes", cap) or cap)
    except Exception:
        pass
    return min(cap * 3 // 4, 100 * 1024 * 1024)


def _softmax_lastdim(logits, out_units):
    """Numerically stable softmax over the last dim of a (rows, out_units) f32 tile."""
    if out_units == 2:
        # 2-way softmax as an elementwise sigmoid: pure VPU/EUP, no cross-lane (XLU)
        # reductions. Clamp the logit gap so exp() cannot overflow; rows sum to 1 by
        # construction (p0 = 1 - p1).
        d = jnp.clip(logits[:, 1:2] - logits[:, 0:1], -60.0, 60.0)
        p1 = pl.reciprocal(1.0 + jnp.exp(-d), approx=True)
        p0 = 1.0 - p1
        col = jax.lax.broadcasted_iota(jnp.int32, logits.shape, dimension=1)
        return jnp.where(col == 0, p0, p1)
    # General path: stable softmax with EXACT division so rows sum to 1 to f32 precision.
    m = jnp.max(logits, axis=-1, keepdims=True)
    e = jnp.exp(logits - m)
    return e / jnp.sum(e, axis=-1, keepdims=True)


def _make_resident_kernel(out_units):
    """w0/b0/w1/b1 fully resident in VMEM; x streamed in batch tiles."""
    def kernel(x_ref, w0_ref, b0_ref, w1_ref, b1_ref, o_ref):
        # Cast the streamed tile to bf16 right before the MXU (never materialized in HBM).
        xb = x_ref[...].astype(jnp.bfloat16)
        h = jnp.dot(xb, w0_ref[...], preferred_element_type=jnp.float32)
        h = jnp.maximum(h + b0_ref[...], 0.0)                      # bias + ReLU in f32
        logits = jnp.dot(h.astype(w1_ref.dtype), w1_ref[...],
                         preferred_element_type=jnp.float32) + b1_ref[...]
        o_ref[...] = _softmax_lastdim(logits, out_units).astype(o_ref.dtype)
    return kernel


def _make_ktiled_kernel(out_units):
    """Fallback for very large inp_units: grid = (batch tiles, K tiles); hidden
    activations accumulate in a f32 VMEM scratch; epilogue runs on the last K step."""
    def kernel(x_ref, w0_ref, b0_ref, w1_ref, b1_ref, o_ref, h_acc):
        k = pl.program_id(1)

        @pl.when(k == 0)
        def _():
            h_acc[...] = jnp.zeros_like(h_acc)

        h_acc[...] += jnp.dot(x_ref[...].astype(jnp.bfloat16), w0_ref[...],
                              preferred_element_type=jnp.float32)

        @pl.when(k == pl.num_programs(1) - 1)
        def _():
            h = jnp.maximum(h_acc[...] + b0_ref[...], 0.0)
            logits = jnp.dot(h.astype(w1_ref.dtype), w1_ref[...],
                             preferred_element_type=jnp.float32) + b1_ref[...]
            o_ref[...] = _softmax_lastdim(logits, out_units).astype(o_ref.dtype)
    return kernel


def _choose_tb(B, k_cols, hid, out_units, x_itemsize, vmem_limit, resident_bytes):
    """Batch-tile rows: sized from bytes-per-step, clamped by VMEM, batch and megacore."""
    # Target ~2 MiB of streamed x per grid step so the ~0.35us per-step overhead amortizes.
    tb = _round_up(max(1, (2 << 20) // max(1, k_cols * x_itemsize)), 256)

    # Approximate per-row VMEM bytes for one grid step: double-buffered x + in-kernel bf16
    # copy, f32 hidden activations (+ bf16 copy), logits, double-buffered f32 output.
    per_row = (2 * k_cols * x_itemsize + 2 * k_cols + 6 * hid + 12 * out_units)
    budget = vmem_limit - resident_bytes - (2 << 20)      # leave 2 MiB slack
    if budget > 0:
        tb = min(tb, max(256, budget // max(1, per_row) // 256 * 256))

    # Megacore (v7x has 2 TensorCores): keep the grid at >= 2 steps for large batches.
    if B >= 512:
        tb = min(tb, _round_up(pl.cdiv(B, 2), 256))

    # Block rows must be a multiple of 8 (sublanes) unless the block spans the whole batch.
    if B >= 8:
        tb = max(8, min(tb, (B // 8) * 8))
    else:
        tb = B
    return tb


def simple_mlp_forward(x, w0, b0, w1, b1, *, force_k_tiled=False, tk=None):
    """Pallas TPU forward for simple_MLP.

    x:  (B, inp_units)            (f32 or bf16)
    w0: (inp_units, hid), b0: (1, hid)         with hid = inp_units // 2
    w1: (hid, out_units), b1: (1, out_units)
    Weights are stored as (in_features, out_features) so the kernel computes x @ W + b.
    Returns (B, out_units) float32 softmax probabilities.
    """
    B, inp_units = x.shape
    hid = w0.shape[1]
    out_units = w1.shape[1]

    # Weights are tiny relative to the x stream: one-time bf16 cast for the MXU.
    w0_in = w0.astype(jnp.bfloat16)
    w1_in = w1.astype(jnp.bfloat16)
    b0_in = b0.astype(jnp.float32).reshape(1, hid)
    b1_in = b1.astype(jnp.float32).reshape(1, out_units)

    x_itemsize = x.dtype.itemsize
    vmem_limit = _vmem_limit_bytes()
    weight_bytes = (inp_units * hid + hid * out_units) * 2 + (hid + out_units) * 4
    use_k_tiled = force_k_tiled or (weight_bytes > vmem_limit // 2)

    cost = pl.CostEstimate(
        flops=2 * B * inp_units * hid + 2 * B * hid * out_units,
        transcendentals=B * out_units,
        bytes_accessed=B * inp_units * x_itemsize + weight_bytes + B * out_units * 4,
    )

    def run(single_buffer_weights):
        w_kwargs = {"pipeline_mode": pl.Buffered(1)} if single_buffer_weights else {}

        if not use_k_tiled:
            tb = _choose_tb(B, inp_units, hid, out_units, x_itemsize, vmem_limit,
                            weight_bytes)
            grid = (pl.cdiv(B, tb),)
            in_specs = [
                pl.BlockSpec((tb, inp_units), lambda i: (i, 0)),                # streamed
                pl.BlockSpec((inp_units, hid), lambda i: (0, 0), **w_kwargs),   # resident
                pl.BlockSpec((1, hid), lambda i: (0, 0), **w_kwargs),           # resident
                pl.BlockSpec((hid, out_units), lambda i: (0, 0), **w_kwargs),   # resident
                pl.BlockSpec((1, out_units), lambda i: (0, 0), **w_kwargs),     # resident
            ]
            out_spec = pl.BlockSpec((tb, out_units), lambda i: (i, 0))
            kernel = _make_resident_kernel(out_units)
            scratch = []
            dims = ("parallel",)
        else:
            # K-tiled fallback: w0 streamed in (tk, hid) slabs along the contraction dim.
            if tk is not None and inp_units % tk == 0:
                tk_ = tk
            elif inp_units % 512 == 0:
                tk_ = 512
            elif inp_units % 128 == 0:
                tk_ = 128
            else:
                tk_ = inp_units  # TODO(synk): pad the K axis instead of a single K step
            kt_resident = ((hid * out_units) * 2 + (hid + out_units) * 4
                           + 2 * tk_ * hid * 2)        # resident w1/b0/b1 + 2x w0 slabs
            tb = _choose_tb(B, tk_, hid, out_units, x_itemsize, vmem_limit, kt_resident)
            grid = (pl.cdiv(B, tb), inp_units // tk_)
            in_specs = [
                pl.BlockSpec((tb, tk_), lambda i, k: (i, k)),
                pl.BlockSpec((tk_, hid), lambda i, k: (k, 0)),
                pl.BlockSpec((1, hid), lambda i, k: (0, 0), **w_kwargs),
                pl.BlockSpec((hid, out_units), lambda i, k: (0, 0), **w_kwargs),
                pl.BlockSpec((1, out_units), lambda i, k: (0, 0), **w_kwargs),
            ]
            out_spec = pl.BlockSpec((tb, out_units), lambda i, k: (i, 0))
            kernel = _make_ktiled_kernel(out_units)
            scratch = [pltpu.VMEM((tb, hid), jnp.float32)]
            dims = ("parallel", "arbitrary")

        return pl.pallas_call(
            kernel,
            out_shape=jax.ShapeDtypeStruct((B, out_units), jnp.float32),
            grid=grid,
            in_specs=in_specs,
            out_specs=out_spec,
            scratch_shapes=scratch,
            compiler_params=pltpu.CompilerParams(
                dimension_semantics=dims,
                vmem_limit_bytes=vmem_limit,
            ),
            cost_estimate=cost,
        )(x, w0_in, b0_in, w1_in, b1_in)

    try:
        return run(single_buffer_weights=True)
    except Exception:
        # pipeline_mode=pl.Buffered(1) unsupported on this JAX build -> default buffering.
        return run(single_buffer_weights=False)


def init_params(key, inp_units, out_units=2):
    """Deterministic init mimicking nn.Linear's uniform(-1/sqrt(fan_in), 1/sqrt(fan_in))."""
    hid = inp_units // 2
    k0, k1, k2, k3 = jax.random.split(key, 4)
    lim0 = 1.0 / jnp.sqrt(inp_units)
    lim1 = 1.0 / jnp.sqrt(hid)
    # stored as (in_features, out_features) so the kernel computes x @ W
    w0 = jax.random.uniform(k0, (inp_units, hid), jnp.float32, -lim0, lim0)
    b0 = jax.random.uniform(k1, (1, hid), jnp.float32, -lim0, lim0)
    w1 = jax.random.uniform(k2, (hid, out_units), jnp.float32, -lim1, lim1)
    b1 = jax.random.uniform(k3, (1, out_units), jnp.float32, -lim1, lim1)
    return w0, b0, w1, b1


def _reference(x, w0, b0, w1, b1):
    h = jnp.maximum(x @ w0 + b0, 0.0)
    return jax.nn.softmax(h @ w1 + b1, axis=-1)


def _check(out, x, params, label):
    ref = _reference(x, *params)
    assert out.shape == ref.shape, label
    assert jnp.allclose(jnp.sum(out, axis=-1), 1.0, atol=1e-5), f"{label}: rows != 1"
    # bf16 MXU operands vs f32 PyTorch reference -> ~1e-3 relative error expected.
    assert jnp.allclose(out, ref, atol=5e-2), f"{label}: mismatch vs f32 reference"


if __name__ == "__main__":
    key = jax.random.PRNGKey(0)
    k1, k2, k3, kp1, kp2, kp3 = jax.random.split(key, 6)

    # 1) Main path: resident weights, out_units == 2 (sigmoid softmax path).
    B, inp, out_u = 8, 32, 2
    x1 = jax.random.normal(k1, (B, inp), jnp.float32)
    p1 = init_params(kp1, inp, out_u)
    o1 = jax.block_until_ready(simple_mlp_forward(x1, *p1))
    _check(o1, x1, p1, "resident/out=2")

    # 2) Resident weights, general softmax path (out_units > 2).
    B, inp, out_u = 16, 64, 4
    x2 = jax.random.normal(k2, (B, inp), jnp.float32)
    p2 = init_params(kp2, inp, out_u)
    o2 = jax.block_until_ready(simple_mlp_forward(x2, *p2))
    _check(o2, x2, p2, "resident/out=4")

    # 3) K-tiled fallback path (forced at small shape to keep it tested).
    B, inp, out_u = 16, 256, 2
    x3 = jax.random.normal(k3, (B, inp), jnp.float32)
    p3 = init_params(kp3, inp, out_u)
    o3 = jax.block_until_ready(simple_mlp_forward(x3, *p3, force_k_tiled=True, tk=128))
    _check(o3, x3, p3, "k-tiled/out=2")

    print("KERNEL_OK")
</pallas_src>

<mosaic_0001>
module attributes {stable_mosaic.version = 11 : i64} {
  func.func @kernel(%arg0: i32, %arg1: memref<8x32xf32, #tpu.memory_space<vmem>>, %arg2: memref<32x16xbf16, #tpu.memory_space<vmem>>, %arg3: memref<1x16xf32, #tpu.memory_space<vmem>>, %arg4: memref<16x2xbf16, #tpu.memory_space<vmem>>, %arg5: memref<1x2xf32, #tpu.memory_space<vmem>>, %arg6: memref<8x2xf32, #tpu.memory_space<vmem>>) attributes {dimension_semantics = [#tpu.dimension_semantics<parallel>], iteration_bounds = array<i64: 1>, scalar_prefetch = 0 : i64, scratch_operands = 0 : i64, tpu.core_type = #tpu.core_type<tc>, window_params = [{transform_indices = @transform_0, window_bounds = array<i64: 8, 32>}, {pipeline_mode = #tpu.pipeline_mode<synchronous>, transform_indices = @transform_1, window_bounds = array<i64: 32, 16>}, {pipeline_mode = #tpu.pipeline_mode<synchronous>, transform_indices = @transform_2, window_bounds = array<i64: 1, 16>}, {pipeline_mode = #tpu.pipeline_mode<synchronous>, transform_indices = @transform_3, window_bounds = array<i64: 16, 2>}, {pipeline_mode = #tpu.pipeline_mode<synchronous>, transform_indices = @transform_4, window_bounds = array<i64: 1, 2>}, {transform_indices = @transform_5, window_bounds = array<i64: 8, 2>}]} {
    %c0 = arith.constant 0 : index
    %c0_0 = arith.constant 0 : index
    %0 = vector.load %arg1[%c0, %c0_0] : memref<8x32xf32, #tpu.memory_space<vmem>>, vector<8x32xf32>
    %1 = arith.truncf %0 : vector<8x32xf32> to vector<8x32xbf16>
    %c0_1 = arith.constant 0 : index
    %c0_2 = arith.constant 0 : index
    %2 = vector.load %arg2[%c0_1, %c0_2] : memref<32x16xbf16, #tpu.memory_space<vmem>>, vector<32x16xbf16>
    %cst = arith.constant dense<0.000000e+00> : vector<8x16xf32>
    %3 = tpu.matmul %1, %2, %cst {dimension_numbers = #tpu.dot_dimension_numbers<[1], [0], [0], [1], [0, 0, 1, 1], [], []>} : vector<8x32xbf16>, vector<32x16xbf16>, vector<8x16xf32> -> vector<8x16xf32>
    %c0_3 = arith.constant 0 : index
    %c0_4 = arith.constant 0 : index
    %4 = vector.load %arg3[%c0_3, %c0_4] : memref<1x16xf32, #tpu.memory_space<vmem>>, vector<1x16xf32>
    %5 = vector.broadcast %4 : vector<1x16xf32> to vector<8x16xf32>
    %6 = arith.addf %3, %5 : vector<8x16xf32>
    %cst_5 = arith.constant 0.000000e+00 : f32
    %7 = vector.broadcast %cst_5 : f32 to vector<8x16xf32>
    %8 = arith.maximumf %6, %7 : vector<8x16xf32>
    %9 = arith.truncf %8 : vector<8x16xf32> to vector<8x16xbf16>
    %c0_6 = arith.constant 0 : index
    %c0_7 = arith.constant 0 : index
    %10 = vector.load %arg4[%c0_6, %c0_7] : memref<16x2xbf16, #tpu.memory_space<vmem>>, vector<16x2xbf16>
    %cst_8 = arith.constant dense<0.000000e+00> : vector<8x2xf32>
    %11 = tpu.matmul %9, %10, %cst_8 {dimension_numbers = #tpu.dot_dimension_numbers<[1], [0], [0], [1], [0, 0, 1, 1], [], []>} : vector<8x16xbf16>, vector<16x2xbf16>, vector<8x2xf32> -> vector<8x2xf32>
    %c0_9 = arith.constant 0 : index
    %c0_10 = arith.constant 0 : index
    %12 = vector.load %arg5[%c0_9, %c0_10] : memref<1x2xf32, #tpu.memory_space<vmem>>, vector<1x2xf32>
    %13 = vector.broadcast %12 : vector<1x2xf32> to vector<8x2xf32>
    %14 = arith.addf %11, %13 : vector<8x2xf32>
    %15 = vector.extract_strided_slice %14 {offsets = [0, 1], sizes = [8, 1], strides = [1, 1]} : vector<8x2xf32> to vector<8x1xf32>
    %16 = vector.extract_strided_slice %14 {offsets = [0, 0], sizes = [8, 1], strides = [1, 1]} : vector<8x2xf32> to vector<8x1xf32>
    %17 = arith.subf %15, %16 : vector<8x1xf32>
    %cst_11 = arith.constant -6.000000e+01 : f32
    %cst_12 = arith.constant 6.000000e+01 : f32
    %18 = vector.broadcast %cst_11 : f32 to vector<8x1xf32>
    %19 = arith.maximumf %18, %17 : vector<8x1xf32>
    %20 = vector.broadcast %cst_12 : f32 to vector<8x1xf32>
    %21 = arith.minimumf %20, %19 : vector<8x1xf32>
    %cst_13 = arith.constant 0.000000e+00 : f32
    %22 = vector.broadcast %cst_13 : f32 to vector<8x1xf32>
    %23 = arith.subf %22, %21 : vector<8x1xf32>
    %24 = math.exp %23 : vector<8x1xf32>
    %cst_14 = arith.constant 1.000000e+00 : f32
    %25 = vector.broadcast %cst_14 : f32 to vector<8x1xf32>
    %26 = arith.addf %25, %24 : vector<8x1xf32>
    %27 = tpu.reciprocal %26 {approx = true} : vector<8x1xf32> -> vector<8x1xf32>
    %cst_15 = arith.constant 1.000000e+00 : f32
    %28 = vector.broadcast %cst_15 : f32 to vector<8x1xf32>
    %29 = arith.subf %28, %27 : vector<8x1xf32>
    %30 = tpu.iota {dimensions = array<i32: 1>} : vector<8x2xi32>
    %c0_i32 = arith.constant 0 : i32
    %31 = vector.broadcast %c0_i32 : i32 to vector<8x2xi32>
    %32 = arith.cmpi eq, %30, %31 : vector<8x2xi32>
    %33 = vector.shape_cast %29 : vector<8x1xf32> to vector<8x1xf32>
    %34 = vector.broadcast %33 : vector<8x1xf32> to vector<8x2xf32>
    %35 = vector.shape_cast %27 : vector<8x1xf32> to vector<8x1xf32>
    %36 = vector.broadcast %35 : vector<8x1xf32> to vector<8x2xf32>
    %37 = arith.select %32, %34, %36 : vector<8x2xi1>, vector<8x2xf32>
    %c0_16 = arith.constant 0 : index
    %c0_17 = arith.constant 0 : index
    %38 = vector.load %arg6[%c0_16, %c0_17] : memref<8x2xf32, #tpu.memory_space<vmem>>, vector<8x2xf32>
    tpu.vector_store %arg6[%c0_16, %c0_17], %37 {strides = array<i32>} : memref<8x2xf32, #tpu.memory_space<vmem>>, vector<8x2xf32>,
    return
  }
  func.func @transform_0(%arg0: i32) -> (i32, i32) {
    %c0_i32 = arith.constant 0 : i32
    %c0_i32_0 = arith.constant 0 : i32
    return %arg0, %c0_i32 : i32, i32
  }
  func.func @transform_1(%arg0: i32) -> (i32, i32) {
    %c0_i32 = arith.constant 0 : i32
    %c0_i32_0 = arith.constant 0 : i32
    %c0_i32_1 = arith.constant 0 : i32
    return %c0_i32, %c0_i32_0 : i32, i32
  }
  func.func @transform_2(%arg0: i32) -> (i32, i32) {
    %c0_i32 = arith.constant 0 : i32
    %c0_i32_0 = arith.constant 0 : i32
    %c0_i32_1 = arith.constant 0 : i32
    return %c0_i32, %c0_i32_0 : i32, i32
  }
  func.func @transform_3(%arg0: i32) -> (i32, i32) {
    %c0_i32 = arith.constant 0 : i32
    %c0_i32_0 = arith.constant 0 : i32
    %c0_i32_1 = arith.constant 0 : i32
    return %c0_i32, %c0_i32_0 : i32, i32
  }
  func.func @transform_4(%arg0: i32) -> (i32, i32) {
    %c0_i32 = arith.constant 0 : i32
    %c0_i32_0 = arith.constant 0 : i32
    %c0_i32_1 = arith.constant 0 : i32
    return %c0_i32, %c0_i32_0 : i32, i32
  }
  func.func @transform_5(%arg0: i32) -> (i32, i32) {
    %c0_i32 = arith.constant 0 : i32
    %c0_i32_0 = arith.constant 0 : i32
    return %arg0, %c0_i32 : i32, i32
  }
}

module attributes {stable_mosaic.version = 11 : i64} {
  func.func @kernel(%arg0: i32, %arg1: memref<8x32xf32, #tpu.memory_space<vmem>>, %arg2: memref<32x16xbf16, #tpu.memory_space<vmem>>, %arg3: memref<1x16xf32, #tpu.memory_space<vmem>>, %arg4: memref<16x2xbf16, #tpu.memory_space<vmem>>, %arg5: memref<1x2xf32, #tpu.memory_space<vmem>>, %arg6: memref<8x2xf32, #tpu.memory_space<vmem>>) attributes {dimension_semantics = [#tpu.dimension_semantics<parallel>], iteration_bounds = array<i64: 1>, scalar_prefetch = 0 : i64, scratch_operands = 0 : i64, tpu.core_type = #tpu.core_type<tc>, window_params = [{transform_indices = @transform_0, window_bounds = array<i64: 8, 32>}, {pipeline_mode = #tpu.pipeline_mode<synchronous>, transform_indices = @transform_1, window_bounds = array<i64: 32, 16>}, {pipeline_mode = #tpu.pipeline_mode<synchronous>, transform_indices = @transform_2, window_bounds = array<i64: 1, 16>}, {pipeline_mode = #tpu.pipeline_mode<synchronous>, transform_indices = @transform_3, window_bounds = array<i64: 16, 2>}, {pipeline_mode = #tpu.pipeline_mode<synchronous>, transform_indices = @transform_4, window_bounds = array<i64: 1, 2>}, {transform_indices = @transform_5, window_bounds = array<i64: 8, 2>}]} {
    %c0 = arith.constant 0 : index
    %c0_0 = arith.constant 0 : index
    %0 = vector.load %arg1[%c0, %c0_0] : memref<8x32xf32, #tpu.memory_space<vmem>>, vector<8x32xf32>
    %1 = arith.truncf %0 : vector<8x32xf32> to vector<8x32xbf16>
    %c0_1 = arith.constant 0 : index
    %c0_2 = arith.constant 0 : index
    %2 = vector.load %arg2[%c0_1, %c0_2] : memref<32x16xbf16, #tpu.memory_space<vmem>>, vector<32x16xbf16>
    %cst = arith.constant dense<0.000000e+00> : vector<8x16xf32>
    %3 = tpu.matmul %1, %2, %cst {dimension_numbers = #tpu.dot_dimension_numbers<[1], [0], [0], [1], [0, 0, 1, 1], [], []>} : vector<8x32xbf16>, vector<32x16xbf16>, vector<8x16xf32> -> vector<8x16xf32>
    %c0_3 = arith.constant 0 : index
    %c0_4 = arith.constant 0 : index
    %4 = vector.load %arg3[%c0_3, %c0_4] : memref<1x16xf32, #tpu.memory_space<vmem>>, vector<1x16xf32>
    %5 = vector.broadcast %4 : vector<1x16xf32> to vector<8x16xf32>
    %6 = arith.addf %3, %5 : vector<8x16xf32>
    %cst_5 = arith.constant 0.000000e+00 : f32
    %7 = vector.broadcast %cst_5 : f32 to vector<8x16xf32>
    %8 = arith.maximumf %6, %7 : vector<8x16xf32>
    %9 = arith.truncf %8 : vector<8x16xf32> to vector<8x16xbf16>
    %c0_6 = arith.constant 0 : index
    %c0_7 = arith.constant 0 : index
    %10 = vector.load %arg4[%c0_6, %c0_7] : memref<16x2xbf16, #tpu.memory_space<vmem>>, vector<16x2xbf16>
    %cst_8 = arith.constant dense<0.000000e+00> : vector<8x2xf32>
    %11 = tpu.matmul %9, %10, %cst_8 {dimension_numbers = #tpu.dot_dimension_numbers<[1], [0], [0], [1], [0, 0, 1, 1], [], []>} : vector<8x16xbf16>, vector<16x2xbf16>, vector<8x2xf32> -> vector<8x2xf32>
    %c0_9 = arith.constant 0 : index
    %c0_10 = arith.constant 0 : index
    %12 = vector.load %arg5[%c0_9, %c0_10] : memref<1x2xf32, #tpu.memory_space<vmem>>, vector<1x2xf32>
    %13 = vector.broadcast %12 : vector<1x2xf32> to vector<8x2xf32>
    %14 = arith.addf %11, %13 : vector<8x2xf32>
    %15 = vector.extract_strided_slice %14 {offsets = [0, 1], sizes = [8, 1], strides = [1, 1]} : vector<8x2xf32> to vector<8x1xf32>
    %16 = vector.extract_strided_slice %14 {offsets = [0, 0], sizes = [8, 1], strides = [1, 1]} : vector<8x2xf32> to vector<8x1xf32>
    %17 = arith.subf %15, %16 : vector<8x1xf32>
    %cst_11 = arith.constant -6.000000e+01 : f32
    %cst_12 = arith.constant 6.000000e+01 : f32
    %18 = vector.broadcast %cst_11 : f32 to vector<8x1xf32>
    %19 = arith.maximumf %18, %17 : vector<8x1xf32>
    %20 = vector.broadcast %cst_12 : f32 to vector<8x1xf32>
    %21 = arith.minimumf %20, %19 : vector<8x1xf32>
    %cst_13 = arith.constant 0.000000e+00 : f32
    %22 = vector.broadcast %cst_13 : f32 to vector<8x1xf32>
    %23 = arith.subf %22, %21 : vector<8x1xf32>
    %24 = math.exp %23 : vector<8x1xf32>
    %cst_14 = arith.constant 1.000000e+00 : f32
    %25 = vector.broadcast %cst_14 : f32 to vector<8x1xf32>
    %26 = arith.addf %25, %24 : vector<8x1xf32>
    %27 = tpu.reciprocal %26 {approx = true} : vector<8x1xf32> -> vector<8x1xf32>
    %cst_15 = arith.constant 1.000000e+00 : f32
    %28 = vector.broadcast %cst_15 : f32 to vector<8x1xf32>
    %29 = arith.subf %28, %27 : vector<8x1xf32>
    %30 = tpu.iota {dimensions = array<i32: 1>} : vector<8x2xi32>
    %c0_i32 = arith.constant 0 : i32
    %31 = vector.broadcast %c0_i32 : i32 to vector<8x2xi32>
    %32 = arith.cmpi eq, %30, %31 : vector<8x2xi32>
    %33 = vector.shape_cast %29 : vector<8x1xf32> to vector<8x1xf32>
    %34 = vector.broadcast %33 : vector<8x1xf32> to vector<8x2xf32>
    %35 = vector.shape_cast %27 : vector<8x1xf32> to vector<8x1xf32>
    %36 = vector.broadcast %35 : vector<8x1xf32> to vector<8x2xf32>
    %37 = arith.select %32, %34, %36 : vector<8x2xi1>, vector<8x2xf32>
    %c0_16 = arith.constant 0 : index
    %c0_17 = arith.constant 0 : index
    %38 = vector.load %arg6[%c0_16, %c0_17] : memref<8x2xf32, #tpu.memory_space<vmem>>, vector<8x2xf32>
    tpu.vector_store %arg6[%c0_16, %c0_17], %37 {strides = array<i32>} : memref<8x2xf32, #tpu.memory_space<vmem>>, vector<8x2xf32>,
    return
  }
  func.func @transform_0(%arg0: i32) -> (i32, i32) {
    %c0_i32 = arith.constant 0 : i32
    %c0_i32_0 = arith.constant 0 : i32
    return %arg0, %c0_i32 : i32, i32
  }
  func.func @transform_1(%arg0: i32) -> (i32, i32) {
    %c0_i32 = arith.constant 0 : i32
    %c0_i32_0 = arith.constant 0 : i32
    %c0_i32_1 = arith.constant 0 : i32
    return %c0_i32, %c0_i32_0 : i32, i32
  }
  func.func @transform_2(%arg0: i32) -> (i32, i32) {
    %c0_i32 = arith.constant 0 : i32
    %c0_i32_0 = arith.constant 0 : i32
    %c0_i32_1 = arith.constant 0 : i32
    return %c0_i32, %c0_i32_0 : i32, i32
  }
  func.func @transform_3(%arg0: i32) -> (i32, i32) {
    %c0_i32 = arith.constant 0 : i32
    %c0_i32_0 = arith.constant 0 : i32
    %c0_i32_1 = arith.constant 0 : i32
    return %c0_i32, %c0_i32_0 : i32, i32
  }
  func.func @transform_4(%arg0: i32) -> (i32, i32) {
    %c0_i32 = arith.constant 0 : i32
    %c0_i32_0 = arith.constant 0 : i32
    %c0_i32_1 = arith.constant 0 : i32
    return %c0_i32, %c0_i32_0 : i32, i32
  }
  func.func @transform_5(%arg0: i32) -> (i32, i32) {
    %c0_i32 = arith.constant 0 : i32
    %c0_i32_0 = arith.constant 0 : i32
    return %arg0, %c0_i32 : i32, i32
  }
}

</mosaic_0001>

<bundles_post_ra>
// kernel: tpu_custom_call.1
= control target key start
LH: loop header
LB: loop body
LE: loop exit
PB: predicated region body
PF: predicated region fallthrough
CT: control target
= control target key end

     0   :  { %v224_v0 = vmov 0.0   ;;  %vm225_vm0 = vmmov 0   ;;  %vm46_vm1 = vcmask 261120   ;;  %vm107_vm2 = vcmask 130048   ;;  %s279_s1 = inlined_call_operand.vmem [shape: bf16[32,16], index: 1, kind: input, shape index: {}]   ;;  %s280_s0 = inlined_call_operand.vmem [shape: f32[8,32], index: 0, kind: input, shape index: {}]   ;;  %s281_s3 = inlined_call_operand.vmem [shape: bf16[16,2], index: 3, kind: input, shape index: {}]   ;;  %s282_s2 = inlined_call_operand.vmem [shape: f32[1,16], index: 2, kind: input, shape index: {}]   ;;  %s283_s4 = inlined_call_operand.vmem [shape: f32[1,2], index: 4, kind: input, shape index: {}]   ;;  %s284_s5 = inlined_call_operand.vmem [shape: f32[8,2], index: 5, kind: output, shape index: {}]  }
   0x1   :  { %197 = vmatprep.subr.bf16.mxu0 %v224_v0  ;;  %v217_v1 = vld [vmem:[%s279_s1] sm:$0xff]   ;;  %201 = vmatprep.mubr.msk.bf16.mxu0 %vm225_vm0, %v224_v0  ;;  %v218_v2 = vld [vmem:[%s279_s1 + $0x8] sm:$0xff]   ;;  %v227_v20 = vmov 1   ;;  %v164_v30 = vlaneseq  ;;  %vm178_vm4 = vcmask 15360  }
   0x2   :  { %205 = vmatprep.subr.bf16.mxu1 %v224_v0  ;;  %207 = vmatprep.mubr.msk.bf16.mxu1 %vm225_vm0, %v224_v0  ;;  %v21_v3 = vld [vmem:[%s280_s0] sm:$0xff] }
   0x3   :  { %198 = vmatpush3.bf16.msra.mxu0 %v217_v1  ;;  %v22_v4 = vpack.c.bf16 %v21_v3, %v21_v3  ;;  %v219_v5 = vld [vmem:[%s281_s3] sm:$0xff]   ;;  %s226_s3 = smov 1   ;;  %216 = vset.pattern.permute.xlu1 %v227_v20  ;;  %v165_v31 = vand.u32 127, %v164_v30 }
   0x4   :  { %199 = vmatprep.subr.bf16.mxu0 %v224_v0  ;;  %206 = vmatpush3.bf16.msra.mxu1 %v219_v5  ;;  %v184_v6 = vld [vmem:[%s282_s2] ss:$0 sm:$0xff] }
   0x5   :  { %v188_v14 = vld [vmem:[%s283_s4] ss:$0 sm:$0xff]  ;;  %215 = vset.pattern.permute.xlu0 %v227_v20  ;;  %vm166_vm3 = vcmp.eq.s32.totalorder %v165_v31, 0 }
   0x7   :  { %200 = vmatpush3.bf16.msra.mxu0 %v218_v2 }
   0xa   :  { %202 = vmatmul.mubr.msk.bf16.vlgmr.msra.gmra.mrb[0].mxu0 %vm46_vm1, %v22_v4 }
  0xdd   :  { %v84_v7 = vpop.f32.mrb[0].mxu0 }
  0xde   :  { %v85_v8 = vadd.f32 %v184_v6, %v84_v7  ;;  %v203_v9 = vpop.f32.mrb[1].mxu0 }
  0xdf   :  { %v87_v10 = vpop.f32.mrb[2].mxu0 }
  0xe0   :  { %v90_v11 = vmax.f32 %v85_v8, 0.0  ;;  %v204_v12 = vpop.f32.mrb[3].mxu0 }
  0xe2   :  { %v91_v13 = vpack.c.bf16 %v90_v11, %v90_v11 }
  0xe4   :  { %208 = vmatmul.mubr.msk.bf16.vlgmr.msra.gmra.mrb[0].mxu1 %vm107_vm2, %v91_v13 }
 0x1b7   :  { %v145_v15 = vpop.f32.mrb[0].mxu1 }
 0x1b8   :  { %v146_v16 = vadd.f32 %v188_v14, %v145_v15  ;;  %v209_v17 = vpop.f32.mrb[1].mxu1 }
 0x1b9   :  { %v148_v18 = vpop.f32.mrb[2].mxu1 }
 0x1ba   :  { %152 = vrot.lane.b32.xlu0 %v146_v16, %s226_s3  ;;  %v210_v19 = vpop.f32.mrb[3].mxu1 }
 0x22c   :  { %v153_v21 = vpop.permute.xlu0 %152 }
 0x22d   :  { %v155_v22 = vsub.f32 %v146_v16, %v153_v21 }
 0x22f   :  { %v191_v23 = vclamps-f32 %v155_v22, 60.0 }
 0x231   :  { %v158_v24 = vsub.f32 0.0, %v191_v23 }
 0x233   :  { %v159_v25 = vmul.f32 1.442695, %v158_v24 }
 0x235   :  { %220 = vpow2.f32 %v159_v25 }
 0x23f   :  { %v221_v26 = vpop.eup %220 }
 0x240   :  { %v161_v27 = vadd.f32 1.0, %v221_v26 }
 0x242   :  { %222 = vrcp.f32 %v161_v27 }
 0x24c   :  { %v223_v28 = vpop.eup %222 }
 0x24d   :  { %174 = vperm.xlu1 %216, %v223_v28   ;;  %v163_v29 = vsub.f32 1.0, %v223_v28 }
 0x24f   :  { %169 = vperm.xlu0 %215, %v163_v29  }
 0x2cc   :  { %v175_v32 = vpop.permute.xlu1 %174 }
 0x2ce   :  { %v170_v33 = vpop.permute.xlu0 %169 }
 0x2cf   :  { %v177_v34 = vsel %vm166_vm3, %v170_v33, %v175_v32 }
 0x2d0   :  { %179 = vst.msk [vmem:[%s284_s5] sm:$0xff] %vm178_vm4, %v177_v34 }

// kernel: tpu_custom_call.1
= control target key start
LH: loop header
LB: loop body
LE: loop exit
PB: predicated region body
PF: predicated region fallthrough
CT: control target
= control target key end

     0   :  { %v224_v0 = vmov 0.0   ;;  %vm225_vm0 = vmmov 0   ;;  %vm46_vm1 = vcmask 261120   ;;  %vm107_vm2 = vcmask 130048   ;;  %s279_s1 = inlined_call_operand.vmem [shape: bf16[32,16], index: 1, kind: input, shape index: {}]   ;;  %s280_s0 = inlined_call_operand.vmem [shape: f32[8,32], index: 0, kind: input, shape index: {}]   ;;  %s281_s3 = inlined_call_operand.vmem [shape: bf16[16,2], index: 3, kind: input, shape index: {}]   ;;  %s282_s2 = inlined_call_operand.vmem [shape: f32[1,16], index: 2, kind: input, shape index: {}]   ;;  %s283_s4 = inlined_call_operand.vmem [shape: f32[1,2], index: 4, kind: input, shape index: {}]   ;;  %s284_s5 = inlined_call_operand.vmem [shape: f32[8,2], index: 5, kind: output, shape index: {}]  }
   0x1   :  { %197 = vmatprep.subr.bf16.mxu0 %v224_v0  ;;  %v217_v1 = vld [vmem:[%s279_s1] sm:$0xff]   ;;  %201 = vmatprep.mubr.msk.bf16.mxu0 %vm225_vm0, %v224_v0  ;;  %v218_v2 = vld [vmem:[%s279_s1 + $0x8] sm:$0xff]   ;;  %v227_v20 = vmov 1   ;;  %v164_v30 = vlaneseq  ;;  %vm178_vm4 = vcmask 15360  }
   0x2   :  { %205 = vmatprep.subr.bf16.mxu1 %v224_v0  ;;  %207 = vmatprep.mubr.msk.bf16.mxu1 %vm225_vm0, %v224_v0  ;;  %v21_v3 = vld [vmem:[%s280_s0] sm:$0xff] }
   0x3   :  { %198 = vmatpush3.bf16.msra.mxu0 %v217_v1  ;;  %v22_v4 = vpack.c.bf16 %v21_v3, %v21_v3  ;;  %v219_v5 = vld [vmem:[%s281_s3] sm:$0xff]   ;;  %s226_s3 = smov 1   ;;  %216 = vset.pattern.permute.xlu1 %v227_v20  ;;  %v165_v31 = vand.u32 127, %v164_v30 }
   0x4   :  { %199 = vmatprep.subr.bf16.mxu0 %v224_v0  ;;  %206 = vmatpush3.bf16.msra.mxu1 %v219_v5  ;;  %v184_v6 = vld [vmem:[%s282_s2] ss:$0 sm:$0xff] }
   0x5   :  { %v188_v14 = vld [vmem:[%s283_s4] ss:$0 sm:$0xff]  ;;  %215 = vset.pattern.permute.xlu0 %v227_v20  ;;  %vm166_vm3 = vcmp.eq.s32.totalorder %v165_v31, 0 }
   0x7   :  { %200 = vmatpush3.bf16.msra.mxu0 %v218_v2 }
   0xa   :  { %202 = vmatmul.mubr.msk.bf16.vlgmr.msra.gmra.mrb[0].mxu0 %vm46_vm1, %v22_v4 }
  0xdd   :  { %v84_v7 = vpop.f32.mrb[0].mxu0 }
  0xde   :  { %v85_v8 = vadd.f32 %v184_v6, %v84_v7  ;;  %v203_v9 = vpop.f32.mrb[1].mxu0 }
  0xdf   :  { %v87_v10 = vpop.f32.mrb[2].mxu0 }
  0xe0   :  { %v90_v11 = vmax.f32 %v85_v8, 0.0  ;;  %v204_v12 = vpop.f32.mrb[3].mxu0 }
  0xe2   :  { %v91_v13 = vpack.c.bf16 %v90_v11, %v90_v11 }
  0xe4   :  { %208 = vmatmul.mubr.msk.bf16.vlgmr.msra.gmra.mrb[0].mxu1 %vm107_vm2, %v91_v13 }
 0x1b7   :  { %v145_v15 = vpop.f32.mrb[0].mxu1 }
 0x1b8   :  { %v146_v16 = vadd.f32 %v188_v14, %v145_v15  ;;  %v209_v17 = vpop.f32.mrb[1].mxu1 }
 0x1b9   :  { %v148_v18 = vpop.f32.mrb[2].mxu1 }
 0x1ba   :  { %152 = vrot.lane.b32.xlu0 %v146_v16, %s226_s3  ;;  %v210_v19 = vpop.f32.mrb[3].mxu1 }
 0x22c   :  { %v153_v21 = vpop.permute.xlu0 %152 }
 0x22d   :  { %v155_v22 = vsub.f32 %v146_v16, %v153_v21 }
 0x22f   :  { %v191_v23 = vclamps-f32 %v155_v22, 60.0 }
 0x231   :  { %v158_v24 = vsub.f32 0.0, %v191_v23 }
 0x233   :  { %v159_v25 = vmul.f32 1.442695, %v158_v24 }
 0x235   :  { %220 = vpow2.f32 %v159_v25 }
 0x23f   :  { %v221_v26 = vpop.eup %220 }
 0x240   :  { %v161_v27 = vadd.f32 1.0, %v221_v26 }
 0x242   :  { %222 = vrcp.f32 %v161_v27 }
 0x24c   :  { %v223_v28 = vpop.eup %222 }
 0x24d   :  { %174 = vperm.xlu1 %216, %v223_v28   ;;  %v163_v29 = vsub.f32 1.0, %v223_v28 }
 0x24f   :  { %169 = vperm.xlu0 %215, %v163_v29  }
 0x2cc   :  { %v175_v32 = vpop.permute.xlu1 %174 }
 0x2ce   :  { %v170_v33 = vpop.permute.xlu0 %169 }
 0x2cf   :  { %v177_v34 = vsel %vm166_vm3, %v170_v33, %v175_v32 }
 0x2d0   :  { %179 = vst.msk [vmem:[%s284_s5] sm:$0xff] %vm178_vm4, %v177_v34 }

</bundles_post_ra>
